<compile_context>
chip_gen: v6e
topology: v6e:2x2x1
jax: 0.10.0
libtpu: 0.0.40
codegen_flags: <defaults>
</compile_context>

<pallas_src>
import jax
import jax.numpy as jnp
from jax.experimental import pallas as pl
from jax.experimental.pallas import tpu as pltpu

LN_EPS = 1e-5  # PyTorch nn.LayerNorm default


def _round_up(n, m):
    return ((n + m - 1) // m) * m


# ----------------------------------------------------------------------------
# Fused kernel: linear(E->F) + ReLU + linear(F->E) + residual + LayerNorm,
# applied to one (TM, E) tile of tokens. Dropout is identity (eval).
# ----------------------------------------------------------------------------
def ffn_block_kernel(x_ref, w1_ref, b1_ref, w2_ref, b2_ref, g_ref, be_ref,
                     out_ref):
    x = x_ref[...]                                              # (TM, E) f32

    # conv1 (k=1) == per-token linear. bf16 operands feed the MXU at full rate
    # on v6e/v7x; accumulation stays f32.
    h = jnp.dot(x.astype(jnp.bfloat16), w1_ref[...].astype(jnp.bfloat16),
                preferred_element_type=jnp.float32) + b1_ref[...]
    h = jnp.maximum(h, 0.0)                                     # ReLU
    # dropout2: identity in eval.

    # conv2 (k=1) == per-token linear, then residual add (f32 elementwise).
    y = x + jnp.dot(h.astype(jnp.bfloat16), w2_ref[...].astype(jnp.bfloat16),
                    preferred_element_type=jnp.float32) + b2_ref[...]

    # LayerNorm over the embedding dim (biased variance, eps=1e-5).
    # Single pass: E[y] and E[y^2] reduce back-to-back; var = E[y^2] - E[y]^2.
    mean = jnp.mean(y, axis=-1, keepdims=True)
    mean_sq = jnp.mean(y * y, axis=-1, keepdims=True)
    var = mean_sq - mean * mean
    out_ref[...] = ((y - mean) * jax.lax.rsqrt(var + LN_EPS)
                    * g_ref[...] + be_ref[...])


def feed_forward_block(x, params, *, tm=256):
    """x: (B, S, E) float32 -> (B, S, E) float32.

    params use the PyTorch layout:
      conv1_w (F, E, 1), conv1_b (F,), conv2_w (E, F, 1), conv2_b (E,),
      ln_w (E,), ln_b (E,).
    """
    B, S, E = x.shape
    F = params["conv1_w"].shape[0]
    N = B * S

    # Host-side layout plumbing: pre-transpose Conv1d weights to (in, out) so
    # the kernel never pays an in-kernel (XLU) transpose; biases / LN params
    # become (1, dim) rows for VPU broadcast.
    w1t = jnp.transpose(params["conv1_w"][:, :, 0])             # (E, F)
    w2t = jnp.transpose(params["conv2_w"][:, :, 0])             # (F, E)
    b1 = params["conv1_b"].reshape(1, F)
    b2 = params["conv2_b"].reshape(1, E)
    gamma = params["ln_w"].reshape(1, E)
    beta = params["ln_b"].reshape(1, E)

    x2d = x.reshape(N, E)

    # Token tile: >= 256 rows (MXU height on v6e/v7x) when enough tokens exist,
    # always a multiple of 8 (sublane). Pad the token dim to a whole tile.
    TM = min(tm, _round_up(N, 8))
    N_pad = _round_up(N, TM)
    if N_pad != N:
        x2d = jnp.pad(x2d, ((0, N_pad - N), (0, 0)))
    n_tiles = N_pad // TM

    # VMEM budget: double-buffered x/out tiles + the (TM, F) intermediate +
    # resident weights, with headroom. Clamp so it fits v7x's 64 MiB physical.
    tile_bytes = TM * (2 * E + F) * 4
    weight_bytes = (2 * E * F + F + 3 * E) * 4
    vmem_bytes = 4 * tile_bytes + 2 * weight_bytes + (2 << 20)
    vmem_bytes = int(max(min(vmem_bytes, 48 << 20), 4 << 20))

    cost = pl.CostEstimate(
        flops=4 * N_pad * E * F,                                # two matmuls
        transcendentals=N_pad,                                  # rsqrt per token
        bytes_accessed=4 * (2 * N_pad * E + 2 * E * F + F + 3 * E),
    )

    out2d = pl.pallas_call(
        ffn_block_kernel,
        out_shape=jax.ShapeDtypeStruct((N_pad, E), jnp.float32),
        grid=(n_tiles,),
        in_specs=[
            pl.BlockSpec((TM, E), lambda i: (i, 0)),            # x tile
            pl.BlockSpec((E, F), lambda i: (0, 0)),             # w1t (resident)
            pl.BlockSpec((1, F), lambda i: (0, 0)),             # b1
            pl.BlockSpec((F, E), lambda i: (0, 0)),             # w2t (resident)
            pl.BlockSpec((1, E), lambda i: (0, 0)),             # b2
            pl.BlockSpec((1, E), lambda i: (0, 0)),             # gamma
            pl.BlockSpec((1, E), lambda i: (0, 0)),             # beta
        ],
        out_specs=pl.BlockSpec((TM, E), lambda i: (i, 0)),
        compiler_params=pltpu.CompilerParams(
            dimension_semantics=("parallel",),
            vmem_limit_bytes=vmem_bytes,
        ),
        cost_estimate=cost,
    )(x2d, w1t, b1, w2t, b2, gamma, beta)

    return out2d[:N].reshape(B, S, E)


# ----------------------------------------------------------------------------
# Pure-JAX reference, consuming the PyTorch weight layout directly (so the
# host-side transposition in the wrapper is actually validated). Mirrors the
# kernel's bf16-matmul / f32-accumulate precision.
# ----------------------------------------------------------------------------
def reference_forward(x, params):
    w1 = params["conv1_w"][:, :, 0]                             # (F, E)
    w2 = params["conv2_w"][:, :, 0]                             # (E, F)
    h = jnp.einsum("bse,fe->bsf", x.astype(jnp.bfloat16), w1.astype(jnp.bfloat16),
                   preferred_element_type=jnp.float32) + params["conv1_b"]
    h = jax.nn.relu(h)
    y = x + jnp.einsum("bsf,ef->bse", h.astype(jnp.bfloat16),
                       w2.astype(jnp.bfloat16),
                       preferred_element_type=jnp.float32) + params["conv2_b"]
    mean = jnp.mean(y, axis=-1, keepdims=True)
    var = jnp.mean(jnp.square(y - mean), axis=-1, keepdims=True)
    return (y - mean) * jax.lax.rsqrt(var + LN_EPS) * params["ln_w"] + params["ln_b"]


if __name__ == "__main__":
    # Small shapes consistent with the module: (batch, seq, embed), ff hidden.
    B, S, E, F = 2, 8, 16, 32

    key = jax.random.PRNGKey(0)
    kx, k1, k2, k3, k4, k5, k6 = jax.random.split(key, 7)
    x = jax.random.normal(kx, (B, S, E), dtype=jnp.float32)

    # Parameters in PyTorch Conv1d / LayerNorm layout.
    params = dict(
        conv1_w=0.2 * jax.random.normal(k1, (F, E, 1), jnp.float32),
        conv1_b=0.2 * jax.random.normal(k2, (F,), jnp.float32),
        conv2_w=0.2 * jax.random.normal(k3, (E, F, 1), jnp.float32),
        conv2_b=0.2 * jax.random.normal(k4, (E,), jnp.float32),
        ln_w=1.0 + 0.1 * jax.random.normal(k5, (E,), jnp.float32),
        ln_b=0.1 * jax.random.normal(k6, (E,), jnp.float32),
    )

    out = jax.block_until_ready(feed_forward_block(x, params))
    assert out.shape == (B, S, E)

    ref = reference_forward(x, params)
    max_err = float(jnp.max(jnp.abs(out - ref)))
    assert jnp.allclose(out, ref, atol=1e-3, rtol=1e-3), max_err

    print("KERNEL_OK")
</pallas_src>

<mosaic_0001>
module attributes {stable_mosaic.version = 11 : i64} {
  func.func @ffn_block_kernel(%arg0: i32, %arg1: memref<16x16xf32, #tpu.memory_space<vmem>>, %arg2: memref<16x32xf32, #tpu.memory_space<vmem>>, %arg3: memref<1x32xf32, #tpu.memory_space<vmem>>, %arg4: memref<32x16xf32, #tpu.memory_space<vmem>>, %arg5: memref<1x16xf32, #tpu.memory_space<vmem>>, %arg6: memref<1x16xf32, #tpu.memory_space<vmem>>, %arg7: memref<1x16xf32, #tpu.memory_space<vmem>>, %arg8: memref<16x16xf32, #tpu.memory_space<vmem>>) attributes {dimension_semantics = [#tpu.dimension_semantics<parallel>], iteration_bounds = array<i64: 1>, scalar_prefetch = 0 : i64, scratch_operands = 0 : i64, tpu.core_type = #tpu.core_type<tc>, window_params = [{transform_indices = @transform_0, window_bounds = array<i64: 16, 16>}, {pipeline_mode = #tpu.pipeline_mode<synchronous>, transform_indices = @transform_1, window_bounds = array<i64: 16, 32>}, {pipeline_mode = #tpu.pipeline_mode<synchronous>, transform_indices = @transform_2, window_bounds = array<i64: 1, 32>}, {pipeline_mode = #tpu.pipeline_mode<synchronous>, transform_indices = @transform_3, window_bounds = array<i64: 32, 16>}, {pipeline_mode = #tpu.pipeline_mode<synchronous>, transform_indices = @transform_4, window_bounds = array<i64: 1, 16>}, {pipeline_mode = #tpu.pipeline_mode<synchronous>, transform_indices = @transform_5, window_bounds = array<i64: 1, 16>}, {pipeline_mode = #tpu.pipeline_mode<synchronous>, transform_indices = @transform_6, window_bounds = array<i64: 1, 16>}, {transform_indices = @transform_7, window_bounds = array<i64: 16, 16>}]} {
    %c0 = arith.constant 0 : index
    %c0_0 = arith.constant 0 : index
    %0 = vector.load %arg1[%c0, %c0_0] : memref<16x16xf32, #tpu.memory_space<vmem>>, vector<16x16xf32>
    %1 = arith.truncf %0 : vector<16x16xf32> to vector<16x16xbf16>
    %c0_1 = arith.constant 0 : index
    %c0_2 = arith.constant 0 : index
    %2 = vector.load %arg2[%c0_1, %c0_2] : memref<16x32xf32, #tpu.memory_space<vmem>>, vector<16x32xf32>
    %3 = arith.truncf %2 : vector<16x32xf32> to vector<16x32xbf16>
    %cst = arith.constant dense<0.000000e+00> : vector<16x32xf32>
    %4 = tpu.matmul %1, %3, %cst {dimension_numbers = #tpu.dot_dimension_numbers<[1], [0], [0], [1], [0, 0, 1, 1], [], []>} : vector<16x16xbf16>, vector<16x32xbf16>, vector<16x32xf32> -> vector<16x32xf32>
    %c0_3 = arith.constant 0 : index
    %c0_4 = arith.constant 0 : index
    %5 = vector.load %arg3[%c0_3, %c0_4] : memref<1x32xf32, #tpu.memory_space<vmem>>, vector<1x32xf32>
    %6 = vector.broadcast %5 : vector<1x32xf32> to vector<16x32xf32>
    %7 = arith.addf %4, %6 : vector<16x32xf32>
    %cst_5 = arith.constant 0.000000e+00 : f32
    %8 = vector.broadcast %cst_5 : f32 to vector<16x32xf32>
    %9 = arith.maximumf %7, %8 : vector<16x32xf32>
    %10 = arith.truncf %9 : vector<16x32xf32> to vector<16x32xbf16>
    %c0_6 = arith.constant 0 : index
    %c0_7 = arith.constant 0 : index
    %11 = vector.load %arg4[%c0_6, %c0_7] : memref<32x16xf32, #tpu.memory_space<vmem>>, vector<32x16xf32>
    %12 = arith.truncf %11 : vector<32x16xf32> to vector<32x16xbf16>
    %cst_8 = arith.constant dense<0.000000e+00> : vector<16x16xf32>
    %13 = tpu.matmul %10, %12, %cst_8 {dimension_numbers = #tpu.dot_dimension_numbers<[1], [0], [0], [1], [0, 0, 1, 1], [], []>} : vector<16x32xbf16>, vector<32x16xbf16>, vector<16x16xf32> -> vector<16x16xf32>
    %14 = arith.addf %0, %13 : vector<16x16xf32>
    %c0_9 = arith.constant 0 : index
    %c0_10 = arith.constant 0 : index
    %15 = vector.load %arg5[%c0_9, %c0_10] : memref<1x16xf32, #tpu.memory_space<vmem>>, vector<1x16xf32>
    %16 = vector.broadcast %15 : vector<1x16xf32> to vector<16x16xf32>
    %17 = arith.addf %14, %16 : vector<16x16xf32>
    %cst_11 = arith.constant dense<0.000000e+00> : vector<16xf32>
    %18 = vector.multi_reduction <add>, %17, %cst_11 [1] : vector<16x16xf32> to vector<16xf32>
    %19 = vector.shape_cast %18 : vector<16xf32> to vector<16x1xf32>
    %cst_12 = arith.constant 1.600000e+01 : f32
    %20 = vector.broadcast %cst_12 : f32 to vector<16x1xf32>
    %21 = arith.divf %19, %20 : vector<16x1xf32>
    %22 = arith.mulf %17, %17 : vector<16x16xf32>
    %cst_13 = arith.constant dense<0.000000e+00> : vector<16xf32>
    %23 = vector.multi_reduction <add>, %22, %cst_13 [1] : vector<16x16xf32> to vector<16xf32>
    %24 = vector.shape_cast %23 : vector<16xf32> to vector<16x1xf32>
    %cst_14 = arith.constant 1.600000e+01 : f32
    %25 = vector.broadcast %cst_14 : f32 to vector<16x1xf32>
    %26 = arith.divf %24, %25 : vector<16x1xf32>
    %27 = arith.mulf %21, %21 : vector<16x1xf32>
    %28 = arith.subf %26, %27 : vector<16x1xf32>
    %29 = vector.broadcast %21 : vector<16x1xf32> to vector<16x16xf32>
    %30 = arith.subf %17, %29 : vector<16x16xf32>
    %cst_15 = arith.constant 9.99999974E-6 : f32
    %31 = vector.broadcast %cst_15 : f32 to vector<16x1xf32>
    %32 = arith.addf %28, %31 : vector<16x1xf32>
    %33 = math.rsqrt %32 : vector<16x1xf32>
    %34 = vector.broadcast %33 : vector<16x1xf32> to vector<16x16xf32>
    %35 = arith.mulf %30, %34 : vector<16x16xf32>
    %c0_16 = arith.constant 0 : index
    %c0_17 = arith.constant 0 : index
    %36 = vector.load %arg6[%c0_16, %c0_17] : memref<1x16xf32, #tpu.memory_space<vmem>>, vector<1x16xf32>
    %37 = vector.broadcast %36 : vector<1x16xf32> to vector<16x16xf32>
    %38 = arith.mulf %35, %37 : vector<16x16xf32>
    %c0_18 = arith.constant 0 : index
    %c0_19 = arith.constant 0 : index
    %39 = vector.load %arg7[%c0_18, %c0_19] : memref<1x16xf32, #tpu.memory_space<vmem>>, vector<1x16xf32>
    %40 = vector.broadcast %39 : vector<1x16xf32> to vector<16x16xf32>
    %41 = arith.addf %38, %40 : vector<16x16xf32>
    %c0_20 = arith.constant 0 : index
    %c0_21 = arith.constant 0 : index
    %42 = vector.load %arg8[%c0_20, %c0_21] : memref<16x16xf32, #tpu.memory_space<vmem>>, vector<16x16xf32>
    tpu.vector_store %arg8[%c0_20, %c0_21], %41 {strides = array<i32>} : memref<16x16xf32, #tpu.memory_space<vmem>>, vector<16x16xf32>,
    return
  }
  func.func @transform_0(%arg0: i32) -> (i32, i32) {
    %c0_i32 = arith.constant 0 : i32
    %c0_i32_0 = arith.constant 0 : i32
    return %arg0, %c0_i32 : i32, i32
  }
  func.func @transform_1(%arg0: i32) -> (i32, i32) {
    %c0_i32 = arith.constant 0 : i32
    %c0_i32_0 = arith.constant 0 : i32
    %c0_i32_1 = arith.constant 0 : i32
    return %c0_i32, %c0_i32_0 : i32, i32
  }
  func.func @transform_2(%arg0: i32) -> (i32, i32) {
    %c0_i32 = arith.constant 0 : i32
    %c0_i32_0 = arith.constant 0 : i32
    %c0_i32_1 = arith.constant 0 : i32
    return %c0_i32, %c0_i32_0 : i32, i32
  }
  func.func @transform_3(%arg0: i32) -> (i32, i32) {
    %c0_i32 = arith.constant 0 : i32
    %c0_i32_0 = arith.constant 0 : i32
    %c0_i32_1 = arith.constant 0 : i32
    return %c0_i32, %c0_i32_0 : i32, i32
  }
  func.func @transform_4(%arg0: i32) -> (i32, i32) {
    %c0_i32 = arith.constant 0 : i32
    %c0_i32_0 = arith.constant 0 : i32
    %c0_i32_1 = arith.constant 0 : i32
    return %c0_i32, %c0_i32_0 : i32, i32
  }
  func.func @transform_5(%arg0: i32) -> (i32, i32) {
    %c0_i32 = arith.constant 0 : i32
    %c0_i32_0 = arith.constant 0 : i32
    %c0_i32_1 = arith.constant 0 : i32
    return %c0_i32, %c0_i32_0 : i32, i32
  }
  func.func @transform_6(%arg0: i32) -> (i32, i32) {
    %c0_i32 = arith.constant 0 : i32
    %c0_i32_0 = arith.constant 0 : i32
    %c0_i32_1 = arith.constant 0 : i32
    return %c0_i32, %c0_i32_0 : i32, i32
  }
  func.func @transform_7(%arg0: i32) -> (i32, i32) {
    %c0_i32 = arith.constant 0 : i32
    %c0_i32_0 = arith.constant 0 : i32
    return %arg0, %c0_i32 : i32, i32
  }
}

</mosaic_0001>

<bundles_post_ra>
// kernel: tpu_custom_call.1
= control target key start
LH: loop header
LB: loop body
LE: loop exit
PB: predicated region body
PF: predicated region fallthrough
CT: control target
= control target key end

     0   :  { %v274_v3 = vmov 0.0   ;;  %vm275_vm0 = vmmov 0   ;;  %s365_s0 = inlined_call_operand.vmem [shape: f32[16,16], index: 0, kind: input, shape index: {}]   ;;  %s366_s1 = inlined_call_operand.vmem [shape: f32[16,32], index: 1, kind: input, shape index: {}]   ;;  %s367_s2 = inlined_call_operand.vmem [shape: f32[1,32], index: 2, kind: input, shape index: {}]   ;;  %s368_s3 = inlined_call_operand.vmem [shape: f32[32,16], index: 3, kind: input, shape index: {}]   ;;  %s369_s4 = inlined_call_operand.vmem [shape: f32[1,16], index: 4, kind: input, shape index: {}]   ;;  %s370_s5 = inlined_call_operand.vmem [shape: f32[1,16], index: 5, kind: input, shape index: {}]   ;;  %s371_s6 = inlined_call_operand.vmem [shape: f32[1,16], index: 6, kind: input, shape index: {}]   ;;  %s372_s7 = inlined_call_operand.hbm [shape: f32[16,16], index: 7, kind: output, shape index: {}]  }
   0x1   :  { %v31_v0 = vld [vmem:[%s366_s1] sm:$0xff]  ;;  %v32_v1 = vld [vmem:[%s366_s1 + $0x8] sm:$0xff]  ;;  %229 = vmatprep.subr.bf16.mxu0 %v274_v3  ;;  %231 = vmatprep.mubr.msk.bf16.mxu0 %vm275_vm0, %v274_v3 }
   0x2   :  { %v28_v2 = vld [vmem:[%s365_s0] sm:$0xff]  ;;  %v33_v4 = vpack.c.bf16 %v32_v1, %v31_v0  ;;  %v29_v5 = vld [vmem:[%s365_s0 + $0x8] sm:$0xff] }
   0x3   :  { %12 = vsyncpa [#allocation3], 0  ;;  %v30_v6 = vpack.c.bf16 %v29_v5, %v28_v2  ;;  %235 = vmatprep.subr.bf16.mxu1 %v274_v3  ;;  %239 = vmatprep.mubr.msk.bf16.mxu1 %vm275_vm0, %v274_v3  ;;  %vm41_vm1 = vcmask 130048   ;;  %v91_v7 = vld [vmem:[%s368_s3 + $0x10] sm:$0xff]  ;;  %v92_v8 = vld [vmem:[%s368_s3 + $0x18] sm:$0xff]  ;;  %vm95_vm2 = vcmask 261120  }
   0x4   :  { %230 = vmatpush3.bf16.msra.mxu0 %v33_v4  ;;  %v94_v9 = vpack.c.bf16 %v92_v8, %v91_v7  ;;  %v89_v10 = vld [vmem:[%s368_s3] sm:$0xff]  ;;  %v90_v11 = vld [vmem:[%s368_s3 + $0x8] sm:$0xff]  ;;  %s276_s20 = smov [#allocation2]  }
   0x5   :  { %v93_v12 = vpack.c.bf16 %v90_v11, %v89_v10  ;;  %v218_v13 = vld [vmem:[%s367_s2] ss:$0 sm:$0xff]  ;;  %s207_s21 = sshll.u32 %s276_s20, 4  ;;  %s208_s21 = int_to_ptr.vmem [resolvable:$true] %s207_s21 }
   0x6   :  { %236 = vmatpush3.bf16.msra.mxu1 %v94_v9  ;;  %v221_v24 = vld [vmem:[%s369_s4] ss:$0 sm:$0xff]  ;;  %p257_p1 = scmp.lt.s32.totalorder %s208_s21, %s208_s21 }
   0x7   :  { %232 = vmatmul.mubr.msk.bf16.vlgmr.msra.gmra.mxu0 %vm41_vm1, %v30_v6  ;;  %237 = vmatprep.subr.bf16.mxu1 %v274_v3  ;;  %v222_v54 = vld [vmem:[%s370_s5] ss:$0 sm:$0xff]  ;;  %s252_s5 = scalar_lea.vmem %s208_s21, 256 }
   0x8   :  { %v223_v56 = vld [vmem:[%s371_s6] ss:$0 sm:$0xff]  ;;  %p253_p0 = scmp.ne.s32.totalorder %s208_s21, %s252_s5  ;;  %p258_p2 = scmp.lt.s32.totalorder %s252_s5, %s252_s5 }
   0xa   :  { %238 = vmatpush3.bf16.msra.mxu1 %v93_v12  ;;  %p259_p3 = por %p258_p2, %p257_p1 }
   0xc   :  { %p260_p4 = pnand %p259_p3, %p253_p0 }
  0xc7   :  { %v79_v14 = vpop.f32.mrf.mxu0 }
  0xc8   :  { %v80_v16 = vadd.f32 %v218_v13, %v79_v14 }
  0xc9   :  { %v233_v15 = vpop.f32.mrf.mxu0 }
  0xca   :  { %v86_v20 = vmax.f32 %v80_v16, 0.0 }
  0xcb   :  { %v82_v17 = vpop.f32.mrf.mxu0 }
  0xcc   :  { %v83_v18 = vadd.f32 %v218_v13, %v82_v17 }
  0xcd   :  { %v234_v19 = vpop.f32.mrf.mxu0 }
  0xce   :  { %v87_v21 = vmax.f32 %v83_v18, 0.0 }
  0xd0   :  { %v88_v22 = vpack.c.bf16 %v87_v21, %v86_v20 }
  0xd2   :  { %240 = vmatmul.mubr.msk.bf16.vlgmr.msra.gmra.mxu1 %vm95_vm2, %v88_v22 }
 0x192   :  { %v133_v23 = vpop.f32.mrf.mxu1 }
 0x193   :  { %v140_v25 = vadd.f32 %v133_v23, %v28_v2 }
 0x194   :  { %v241_v26 = vpop.f32.mrf.mxu1 }
 0x195   :  { %v149_v27 = vadd.f32 %v221_v24, %v140_v25 }
 0x196   :  { %v136_v28 = vpop.f32.mrf.mxu1 }
 0x197   :  { %v141_v29 = vadd.f32 %v136_v28, %v29_v5  ;;  %v151_v30 = vsel %vm41_vm1, %v149_v27, 0.0  ;;  %v160_v31 = vmul.f32 %v149_v27, %v149_v27 }
 0x198   :  { %152 = vadd.xlane.f32.xlu0 %v151_v30  ;;  %v242_v32 = vpop.f32.mrf.mxu1 }
 0x199   :  { %v150_v33 = vadd.f32 %v221_v24, %v141_v29  ;;  %v162_v34 = vsel %vm41_vm1, %v160_v31, 0.0 }
 0x19a   :  { %163 = vadd.xlane.f32.xlu1 %v162_v34 }
 0x19b   :  { %v154_v35 = vsel %vm41_vm1, %v150_v33, 0.0  ;;  %v161_v36 = vmul.f32 %v150_v33, %v150_v33 }
 0x19c   :  { %155 = vadd.xlane.f32.xlu0 %v154_v35 }
 0x19d   :  { %v165_v37 = vsel %vm41_vm1, %v161_v36, 0.0 }
 0x19e   :  { %166 = vadd.xlane.f32.xlu1 %v165_v37 }
 0x221   :  { %v153_v38 = vpop.xlane.xlu0 %152 }
 0x222   :  { %v158_v39 = vmul.f32 0.0625, %v153_v38 }
 0x223   :  { %v164_v40 = vpop.xlane.xlu1 %163 }
 0x224   :  { %v170_v41 = vmul.f32 %v158_v39, %v158_v39  ;;  %v168_v42 = vmul.f32 0.0625, %v164_v40  ;;  %v174_v52 = vsub.f32 %v149_v27, %v158_v39 }
 0x225   :  { %v156_v43 = vpop.xlane.xlu0 %155 }
 0x226   :  { %v172_v44 = vsub.f32 %v168_v42, %v170_v41  ;;  %v159_v45 = vmul.f32 0.0625, %v156_v43 }
 0x227   :  { %v167_v46 = vpop.xlane.xlu1 %166 }
 0x228   :  { %v176_v47 = vadd.f32 1e-05, %v172_v44  ;;  %v171_v48 = vmul.f32 %v159_v45, %v159_v45  ;;  %v169_v49 = vmul.f32 0.0625, %v167_v46  ;;  %v175_v57 = vsub.f32 %v150_v33, %v159_v45 }
 0x22a   :  { %248 = vrsqrt.f32 %v176_v47  ;;  %v173_v50 = vsub.f32 %v169_v49, %v171_v48 }
 0x22c   :  { %v177_v51 = vadd.f32 1e-05, %v173_v50 }
 0x22e   :  { %250 = vrsqrt.f32 %v177_v51 }
 0x237   :  { %v249_v53 = vpop.eup %248 }
 0x238   :  { %v180_v55 = vmul.f32 %v249_v53, %v174_v52 }
 0x23a   :  { %v189_v58 = vmul.f32 %v222_v54, %v180_v55 }
 0x23b   :  { %v251_v59 = vpop.eup %250 }
 0x23c   :  { %v181_v60 = vmul.f32 %v251_v59, %v175_v57  ;;  %v198_v61 = vadd.f32 %v223_v56, %v189_v58 }
 0x23e   :  { %v190_v62 = vmul.f32 %v222_v54, %v181_v60  ;;  %200 = vst.msk [vmem:[#allocation2] sm:$0xff] %vm41_vm1, %v198_v61 }
 0x240   :  { %v199_v63 = vadd.f32 %v223_v56, %v190_v62 }
 0x242   :  { %201 = vst.msk [vmem:[#allocation2 + $0x8] sm:$0xff] %vm41_vm1, %v199_v63 }
 0x243   :  { %263 = shalt.err (!%p260_p4)
}
 0x244   :  { %s277_s6 = smov 128   ;;  %s278_s22 = smov 8  }
 0x245   :  { %213 = dma.vmem_to_hbm [thread:$0]  %s208_s21, 256, %s372_s7, [#allocation3], %s277_s6, %s277_s6, %s278_s22  }
 0x246   :  { %272 = dma.done.wait [#allocation3], 256  }
 0x247   :  { %273 = vsyncadd [#allocation3], 4294967040 }
 0x248   :  { %217 = vsyncpa [#allocation3], 1 }

</bundles_post_ra>
